<compile_context>
chip_gen: v7x
topology: tpu7x:2x2x1
jax: 0.10.0
libtpu: 0.0.40
codegen_flags: <defaults>
</compile_context>

<pallas_src>
import functools

import jax
import jax.numpy as jnp
import numpy as np
from jax.experimental import pallas as pl
from jax.experimental.pallas import tpu as pltpu


# ------------------------------ Pallas kernel --------------------------------


def _bilstm_fused_kernel(x_ref, wih_ref, bih_ref, whh_ref, wemb_ref, bemb_ref,
                         out_ref, recf_sc, recb_sc, *, T, B, H):
    H2 = 2 * H          # width of one gate block and of packed h/c ([fwd|bwd])
    H6 = 6 * H          # width of the sigmoid (i|f|o) region
    H8 = 8 * H

    # ---- Prologue (off the serial chain) -------------------------------------
    # ONE batched input projection for every timestep and both directions:
    #   (T*B, nIn) @ (nIn, 8H)   instead of T tiny sublane-padded matmuls.
    x_bf = x_ref[...].astype(jnp.bfloat16)
    gx = (jnp.dot(x_bf, wih_ref[...], preferred_element_type=jnp.float32)
          + bih_ref[...])                                       # (T*B, 8H) f32

    # Merge fwd/bwd time order once, outside the recurrence: step t consumes
    # x[t] on the forward lanes and x[T-1-t] on the backward lanes.
    lane = jax.lax.broadcasted_iota(jnp.int32, (B, H8), 1)
    fwd_mask = (lane % H2) < H                  # fwd half of every gate block
    gxm = []
    for t in range(T):                          # static; embarrassingly parallel
        fwd_rows = gx[t * B:(t + 1) * B]
        bwd_rows = gx[(T - 1 - t) * B:(T - t) * B]
        gxm.append(jnp.where(fwd_mask, fwd_rows, bwd_rows))

    # ---- Recurrence (the serial critical path) -------------------------------
    # h/c live purely in vregs (loop-carried values of a static unroll); W_hh is
    # block-diagonal (2H, 8H) so both directions share ONE MXU matmul per step.
    whh = whh_ref[...]                                          # (2H, 8H) bf16
    h = jnp.zeros((B, H2), jnp.float32)
    c = jnp.zeros((B, H2), jnp.float32)
    for t in range(T):                          # static unroll (T is small)
        gh = jnp.dot(h.astype(jnp.bfloat16), whh,
                     preferred_element_type=jnp.float32)        # (B, 8H) f32
        gates = gxm[t] + gh
        # Gate layout [ i | f | o | g ]: sigmoid only on i|f|o, tanh only on g.
        sig = jax.nn.sigmoid(gates[:, :H6])
        g_g = jnp.tanh(gates[:, H6:])
        i_g = sig[:, 0 * H2:1 * H2]
        f_g = sig[:, 1 * H2:2 * H2]
        o_g = sig[:, 2 * H2:3 * H2]
        c = f_g * c + i_g * g_g
        h = o_g * jnp.tanh(c)
        # Record per-timestep hidden (vst slot; overlaps next step's matmul).
        recf_sc[pl.ds(t * B, B), :] = h[:, :H]            # forward  -> time t
        recb_sc[pl.ds((T - 1 - t) * B, B), :] = h[:, H:]  # backward -> time T-1-t

    # ---- Epilogue: fused nn.Linear as ONE batched matmul ---------------------
    rec = jnp.concatenate([recf_sc[...], recb_sc[...]], axis=-1)   # (T*B, 2H)
    out_ref[...] = (jnp.dot(rec.astype(jnp.bfloat16), wemb_ref[...],
                            preferred_element_type=jnp.float32)
                    + bemb_ref[...]).astype(out_ref.dtype)


# ------------------------------ wrapper ---------------------------------------


_GATE_ORDER = np.array([0, 1, 3, 2])   # PyTorch [i,f,g,o] -> kernel [i,f,o,g]


def pack_params(params):
    """Pack weights for the fused kernel. Called ONCE at init (not per call)."""
    H = params["whh_f"].shape[0]

    def pack(w_f, w_b):
        rows = w_f.shape[0]
        wf = w_f.reshape(rows, 4, H)[:, _GATE_ORDER, :]
        wb = w_b.reshape(rows, 4, H)[:, _GATE_ORDER, :]
        # Per gate block: [fwd (H) | bwd (H)]  ->  (rows, 8H)
        return jnp.stack([wf, wb], axis=2).reshape(rows, 8 * H)

    zf = jnp.zeros_like(params["whh_f"])
    zb = jnp.zeros_like(params["whh_b"])
    return {
        "wih": pack(params["wih_f"], params["wih_b"]).astype(jnp.bfloat16),
        "b": pack(params["b_f"], params["b_b"]),                    # f32
        "whh": jnp.concatenate([pack(params["whh_f"], zf),          # block-diag
                                pack(zb, params["whh_b"])],
                               axis=0).astype(jnp.bfloat16),        # (2H, 8H)
        "w_emb": params["w_emb"].astype(jnp.bfloat16),              # (2H, nOut)
        "b_emb": params["b_emb"],                                   # f32
    }


@jax.jit
def bidirectional_lstm_forward(x, packed):
    """Full module forward: (T, B, nIn) -> (T, B, nOut)."""
    T, B, nIn = x.shape
    H = packed["whh"].shape[0] // 2
    nOut = packed["w_emb"].shape[1]

    kernel = functools.partial(_bilstm_fused_kernel, T=T, B=B, H=H)
    out = pl.pallas_call(
        kernel,
        out_shape=jax.ShapeDtypeStruct((T * B, nOut), jnp.float32),
        # No grid: single invocation; whole working set (<100 KB) is VMEM
        # resident (default whole-array specs); state lives in vregs/scratch.
        scratch_shapes=[
            pltpu.VMEM((T * B, H), jnp.float32),   # forward hidden, row-block t
            pltpu.VMEM((T * B, H), jnp.float32),   # backward hidden, row-block T-1-t
        ],
    )(x.reshape(T * B, nIn), packed["wih"], packed["b"], packed["whh"],
      packed["w_emb"], packed["b_emb"])
    return out.reshape(T, B, nOut)


# ----------------------------- reference (pure JAX) ---------------------------


def _lstm_scan_ref(x, w_ih, w_hh, b, H):
    B = x.shape[1]

    def step(carry, x_t):
        h, c = carry
        gates = x_t @ w_ih + h @ w_hh + b
        i = jax.nn.sigmoid(gates[:, :H])
        f = jax.nn.sigmoid(gates[:, H:2 * H])
        g = jnp.tanh(gates[:, 2 * H:3 * H])
        o = jax.nn.sigmoid(gates[:, 3 * H:])
        c = f * c + i * g
        h = o * jnp.tanh(c)
        return (h, c), h

    init = (jnp.zeros((B, H), jnp.float32), jnp.zeros((B, H), jnp.float32))
    _, hs = jax.lax.scan(step, init, x)
    return hs


def reference_forward(x, params):
    H = params["whh_f"].shape[0]
    T, B, _ = x.shape
    hf = _lstm_scan_ref(x, params["wih_f"], params["whh_f"], params["b_f"], H)
    hb = _lstm_scan_ref(x[::-1], params["wih_b"], params["whh_b"],
                        params["b_b"], H)[::-1]
    rec = jnp.concatenate([hf, hb], axis=-1)
    out = rec.reshape(T * B, -1) @ params["w_emb"] + params["b_emb"]
    return out.reshape(T, B, -1)


# ------------------------------- parameters -----------------------------------


def init_params(key, nIn, nHidden, nOut):
    # PyTorch nn.LSTM / nn.Linear default init: U(-1/sqrt(fan), 1/sqrt(fan)).
    k_lstm = 1.0 / np.sqrt(nHidden)
    k_lin = 1.0 / np.sqrt(2 * nHidden)
    keys = jax.random.split(key, 10)

    def u(k, shape, bound):
        return jax.random.uniform(k, shape, jnp.float32, -bound, bound)

    # Stored transposed w.r.t. PyTorch: (nIn, 4H) / (H, 4H); gate order i,f,g,o.
    params = {
        "wih_f": u(keys[0], (nIn, 4 * nHidden), k_lstm),
        "whh_f": u(keys[1], (nHidden, 4 * nHidden), k_lstm),
        "b_f": (u(keys[2], (1, 4 * nHidden), k_lstm)
                + u(keys[3], (1, 4 * nHidden), k_lstm)),   # b_ih + b_hh
        "wih_b": u(keys[4], (nIn, 4 * nHidden), k_lstm),
        "whh_b": u(keys[5], (nHidden, 4 * nHidden), k_lstm),
        "b_b": (u(keys[6], (1, 4 * nHidden), k_lstm)
                + u(keys[7], (1, 4 * nHidden), k_lstm)),
        "w_emb": u(keys[8], (2 * nHidden, nOut), k_lin),
        "b_emb": u(keys[9], (1, nOut), k_lin),
    }
    return params


# ---------------------------------- main ---------------------------------------


if __name__ == "__main__":
    # TODO(synk): raise B (>= 8, ideally >= 128) at the call site when the
    # surrounding model permits — batch is the only lever that turns this
    # latency-bound recurrence into real MXU throughput.
    T, B, nIn, nHidden, nOut = 8, 2, 32, 32, 16

    key = jax.random.PRNGKey(0)
    k_x, k_p = jax.random.split(key)
    x = jax.random.normal(k_x, (T, B, nIn), jnp.float32)
    params = init_params(k_p, nIn, nHidden, nOut)
    packed = pack_params(params)              # packed once, outside the jit

    out = jax.block_until_ready(bidirectional_lstm_forward(x, packed))
    ref = jax.block_until_ready(reference_forward(x, params))

    assert out.shape == (T, B, nOut)
    # Kernel uses bf16 MXU operands (f32 accumulation); reference is pure f32.
    np.testing.assert_allclose(np.asarray(out), np.asarray(ref),
                               atol=2e-2, rtol=2e-2)

    print("KERNEL_OK")
</pallas_src>

<mosaic_0001>
module attributes {stable_mosaic.version = 11 : i64} {
  func.func @_bilstm_fused_kernel(%arg0: memref<16x32xf32, #tpu.memory_space<vmem>>, %arg1: memref<32x256xbf16, #tpu.memory_space<vmem>>, %arg2: memref<1x256xf32, #tpu.memory_space<vmem>>, %arg3: memref<64x256xbf16, #tpu.memory_space<vmem>>, %arg4: memref<64x16xbf16, #tpu.memory_space<vmem>>, %arg5: memref<1x16xf32, #tpu.memory_space<vmem>>, %arg6: memref<16x16xf32, #tpu.memory_space<vmem>>, %arg7: memref<16x32xf32, #tpu.memory_space<vmem>>, %arg8: memref<16x32xf32, #tpu.memory_space<vmem>>) attributes {dimension_semantics = [], scalar_prefetch = 0 : i64, scratch_operands = 2 : i64, tpu.core_type = #tpu.core_type<tc>} {
    %c0 = arith.constant 0 : index
    %c0_0 = arith.constant 0 : index
    %0 = vector.load %arg0[%c0, %c0_0] : memref<16x32xf32, #tpu.memory_space<vmem>>, vector<16x32xf32>
    %1 = arith.truncf %0 : vector<16x32xf32> to vector<16x32xbf16>
    %c0_1 = arith.constant 0 : index
    %c0_2 = arith.constant 0 : index
    %2 = vector.load %arg1[%c0_1, %c0_2] : memref<32x256xbf16, #tpu.memory_space<vmem>>, vector<32x256xbf16>
    %cst = arith.constant dense<0.000000e+00> : vector<16x256xf32>
    %3 = tpu.matmul %1, %2, %cst {dimension_numbers = #tpu.dot_dimension_numbers<[1], [0], [0], [1], [0, 0, 1, 1], [], []>} : vector<16x32xbf16>, vector<32x256xbf16>, vector<16x256xf32> -> vector<16x256xf32>
    %c0_3 = arith.constant 0 : index
    %c0_4 = arith.constant 0 : index
    %4 = vector.load %arg2[%c0_3, %c0_4] : memref<1x256xf32, #tpu.memory_space<vmem>>, vector<1x256xf32>
    %5 = vector.broadcast %4 : vector<1x256xf32> to vector<16x256xf32>
    %6 = arith.addf %3, %5 : vector<16x256xf32>
    %7 = tpu.iota {dimensions = array<i32: 1>} : vector<2x256xi32>
    %c64_i32 = arith.constant 64 : i32
    %c0_i32 = arith.constant 0 : i32
    %8 = arith.cmpi eq, %c64_i32, %c0_i32 : i32
    %c1_i32 = arith.constant 1 : i32
    %9 = arith.select %8, %c1_i32, %c64_i32 : i32
    %10 = vector.broadcast %9 : i32 to vector<2x256xi32>
    %11 = arith.remsi %7, %10 : vector<2x256xi32>
    %c0_i32_5 = arith.constant 0 : i32
    %12 = vector.broadcast %c0_i32_5 : i32 to vector<2x256xi32>
    %13 = arith.cmpi ne, %11, %12 : vector<2x256xi32>
    %c0_i32_6 = arith.constant 0 : i32
    %14 = vector.broadcast %c0_i32_6 : i32 to vector<2x256xi32>
    %15 = arith.cmpi slt, %11, %14 : vector<2x256xi32>
    %c0_i32_7 = arith.constant 0 : i32
    %16 = arith.cmpi slt, %9, %c0_i32_7 : i32
    %17 = vector.broadcast %16 : i1 to vector<2x256xi1>
    %18 = vector.broadcast %17 : vector<2x256xi1> to vector<2x256xi1>
    %19 = arith.xori %15, %18 : vector<2x256xi1>
    %20 = arith.andi %19, %13 : vector<2x256xi1>
    %21 = vector.broadcast %9 : i32 to vector<2x256xi32>
    %22 = arith.addi %11, %21 : vector<2x256xi32>
    %23 = arith.select %20, %22, %11 : vector<2x256xi1>, vector<2x256xi32>
    %c32_i32 = arith.constant 32 : i32
    %24 = vector.broadcast %c32_i32 : i32 to vector<2x256xi32>
    %25 = arith.cmpi slt, %23, %24 : vector<2x256xi32>
    %26 = vector.extract_strided_slice %6 {offsets = [0, 0], sizes = [2, 256], strides = [1, 1]} : vector<16x256xf32> to vector<2x256xf32>
    %27 = vector.extract_strided_slice %6 {offsets = [14, 0], sizes = [2, 256], strides = [1, 1]} : vector<16x256xf32> to vector<2x256xf32>
    %28 = arith.select %25, %26, %27 : vector<2x256xi1>, vector<2x256xf32>
    %29 = vector.extract_strided_slice %6 {offsets = [2, 0], sizes = [2, 256], strides = [1, 1]} : vector<16x256xf32> to vector<2x256xf32>
    %30 = vector.extract_strided_slice %6 {offsets = [12, 0], sizes = [2, 256], strides = [1, 1]} : vector<16x256xf32> to vector<2x256xf32>
    %31 = arith.select %25, %29, %30 : vector<2x256xi1>, vector<2x256xf32>
    %32 = vector.extract_strided_slice %6 {offsets = [4, 0], sizes = [2, 256], strides = [1, 1]} : vector<16x256xf32> to vector<2x256xf32>
    %33 = vector.extract_strided_slice %6 {offsets = [10, 0], sizes = [2, 256], strides = [1, 1]} : vector<16x256xf32> to vector<2x256xf32>
    %34 = arith.select %25, %32, %33 : vector<2x256xi1>, vector<2x256xf32>
    %35 = vector.extract_strided_slice %6 {offsets = [6, 0], sizes = [2, 256], strides = [1, 1]} : vector<16x256xf32> to vector<2x256xf32>
    %36 = vector.extract_strided_slice %6 {offsets = [8, 0], sizes = [2, 256], strides = [1, 1]} : vector<16x256xf32> to vector<2x256xf32>
    %37 = arith.select %25, %35, %36 : vector<2x256xi1>, vector<2x256xf32>
    %38 = vector.extract_strided_slice %6 {offsets = [8, 0], sizes = [2, 256], strides = [1, 1]} : vector<16x256xf32> to vector<2x256xf32>
    %39 = vector.extract_strided_slice %6 {offsets = [6, 0], sizes = [2, 256], strides = [1, 1]} : vector<16x256xf32> to vector<2x256xf32>
    %40 = arith.select %25, %38, %39 : vector<2x256xi1>, vector<2x256xf32>
    %41 = vector.extract_strided_slice %6 {offsets = [10, 0], sizes = [2, 256], strides = [1, 1]} : vector<16x256xf32> to vector<2x256xf32>
    %42 = vector.extract_strided_slice %6 {offsets = [4, 0], sizes = [2, 256], strides = [1, 1]} : vector<16x256xf32> to vector<2x256xf32>
    %43 = arith.select %25, %41, %42 : vector<2x256xi1>, vector<2x256xf32>
    %44 = vector.extract_strided_slice %6 {offsets = [12, 0], sizes = [2, 256], strides = [1, 1]} : vector<16x256xf32> to vector<2x256xf32>
    %45 = vector.extract_strided_slice %6 {offsets = [2, 0], sizes = [2, 256], strides = [1, 1]} : vector<16x256xf32> to vector<2x256xf32>
    %46 = arith.select %25, %44, %45 : vector<2x256xi1>, vector<2x256xf32>
    %47 = vector.extract_strided_slice %6 {offsets = [14, 0], sizes = [2, 256], strides = [1, 1]} : vector<16x256xf32> to vector<2x256xf32>
    %48 = vector.extract_strided_slice %6 {offsets = [0, 0], sizes = [2, 256], strides = [1, 1]} : vector<16x256xf32> to vector<2x256xf32>
    %49 = arith.select %25, %47, %48 : vector<2x256xi1>, vector<2x256xf32>
    %c0_8 = arith.constant 0 : index
    %c0_9 = arith.constant 0 : index
    %50 = vector.load %arg3[%c0_8, %c0_9] : memref<64x256xbf16, #tpu.memory_space<vmem>>, vector<64x256xbf16>
    %cst_10 = arith.constant 0.000000e+00 : f32
    %51 = vector.broadcast %cst_10 : f32 to vector<2x64xf32>
    %cst_11 = arith.constant 0.000000e+00 : f32
    %52 = vector.broadcast %cst_11 : f32 to vector<2x64xf32>
    %53 = arith.truncf %51 : vector<2x64xf32> to vector<2x64xbf16>
    %cst_12 = arith.constant dense<0.000000e+00> : vector<2x256xf32>
    %54 = tpu.matmul %53, %50, %cst_12 {dimension_numbers = #tpu.dot_dimension_numbers<[1], [0], [0], [1], [0, 0, 1, 1], [], []>} : vector<2x64xbf16>, vector<64x256xbf16>, vector<2x256xf32> -> vector<2x256xf32>
    %55 = arith.addf %28, %54 : vector<2x256xf32>
    %56 = vector.extract_strided_slice %55 {offsets = [0, 0], sizes = [2, 192], strides = [1, 1]} : vector<2x256xf32> to vector<2x192xf32>
    %57 = arith.negf %56 : vector<2x192xf32>
    %58 = math.exp %57 : vector<2x192xf32>
    %cst_13 = arith.constant 1.000000e+00 : f32
    %59 = vector.broadcast %cst_13 : f32 to vector<2x192xf32>
    %60 = arith.addf %59, %58 : vector<2x192xf32>
    %61 = arith.divf %59, %60 : vector<2x192xf32>
    %62 = vector.extract_strided_slice %55 {offsets = [0, 192], sizes = [2, 64], strides = [1, 1]} : vector<2x256xf32> to vector<2x64xf32>
    %63 = math.tanh %62 : vector<2x64xf32>
    %64 = vector.extract_strided_slice %61 {offsets = [0, 0], sizes = [2, 64], strides = [1, 1]} : vector<2x192xf32> to vector<2x64xf32>
    %65 = vector.extract_strided_slice %61 {offsets = [0, 64], sizes = [2, 64], strides = [1, 1]} : vector<2x192xf32> to vector<2x64xf32>
    %66 = vector.extract_strided_slice %61 {offsets = [0, 128], sizes = [2, 64], strides = [1, 1]} : vector<2x192xf32> to vector<2x64xf32>
    %67 = arith.mulf %65, %52 : vector<2x64xf32>
    %68 = arith.mulf %64, %63 : vector<2x64xf32>
    %69 = arith.addf %67, %68 : vector<2x64xf32>
    %70 = math.tanh %69 : vector<2x64xf32>
    %71 = arith.mulf %66, %70 : vector<2x64xf32>
    %72 = vector.extract_strided_slice %71 {offsets = [0, 0], sizes = [2, 32], strides = [1, 1]} : vector<2x64xf32> to vector<2x32xf32>
    %c0_14 = arith.constant 0 : index
    %c0_15 = arith.constant 0 : index
    %73 = vector.load %arg7[%c0_14, %c0_15] : memref<16x32xf32, #tpu.memory_space<vmem>>, vector<2x32xf32>
    tpu.vector_store %arg7[%c0_14, %c0_15], %72 {strides = array<i32>} : memref<16x32xf32, #tpu.memory_space<vmem>>, vector<2x32xf32>,
    %74 = vector.extract_strided_slice %71 {offsets = [0, 32], sizes = [2, 32], strides = [1, 1]} : vector<2x64xf32> to vector<2x32xf32>
    %c14 = arith.constant 14 : index
    %c0_16 = arith.constant 0 : index
    %75 = vector.load %arg8[%c14, %c0_16] : memref<16x32xf32, #tpu.memory_space<vmem>>, vector<2x32xf32>
    tpu.vector_store %arg8[%c14, %c0_16], %74 {strides = array<i32>} : memref<16x32xf32, #tpu.memory_space<vmem>>, vector<2x32xf32>,
    %76 = arith.truncf %71 : vector<2x64xf32> to vector<2x64xbf16>
    %cst_17 = arith.constant dense<0.000000e+00> : vector<2x256xf32>
    %77 = tpu.matmul %76, %50, %cst_17 {dimension_numbers = #tpu.dot_dimension_numbers<[1], [0], [0], [1], [0, 0, 1, 1], [], []>} : vector<2x64xbf16>, vector<64x256xbf16>, vector<2x256xf32> -> vector<2x256xf32>
    %78 = arith.addf %31, %77 : vector<2x256xf32>
    %79 = vector.extract_strided_slice %78 {offsets = [0, 0], sizes = [2, 192], strides = [1, 1]} : vector<2x256xf32> to vector<2x192xf32>
    %80 = arith.negf %79 : vector<2x192xf32>
    %81 = math.exp %80 : vector<2x192xf32>
    %cst_18 = arith.constant 1.000000e+00 : f32
    %82 = vector.broadcast %cst_18 : f32 to vector<2x192xf32>
    %83 = arith.addf %82, %81 : vector<2x192xf32>
    %84 = arith.divf %82, %83 : vector<2x192xf32>
    %85 = vector.extract_strided_slice %78 {offsets = [0, 192], sizes = [2, 64], strides = [1, 1]} : vector<2x256xf32> to vector<2x64xf32>
    %86 = math.tanh %85 : vector<2x64xf32>
    %87 = vector.extract_strided_slice %84 {offsets = [0, 0], sizes = [2, 64], strides = [1, 1]} : vector<2x192xf32> to vector<2x64xf32>
    %88 = vector.extract_strided_slice %84 {offsets = [0, 64], sizes = [2, 64], strides = [1, 1]} : vector<2x192xf32> to vector<2x64xf32>
    %89 = vector.extract_strided_slice %84 {offsets = [0, 128], sizes = [2, 64], strides = [1, 1]} : vector<2x192xf32> to vector<2x64xf32>
    %90 = arith.mulf %88, %69 : vector<2x64xf32>
    %91 = arith.mulf %87, %86 : vector<2x64xf32>
    %92 = arith.addf %90, %91 : vector<2x64xf32>
    %93 = math.tanh %92 : vector<2x64xf32>
    %94 = arith.mulf %89, %93 : vector<2x64xf32>
    %95 = vector.extract_strided_slice %94 {offsets = [0, 0], sizes = [2, 32], strides = [1, 1]} : vector<2x64xf32> to vector<2x32xf32>
    %c2 = arith.constant 2 : index
    %c0_19 = arith.constant 0 : index
    %96 = vector.load %arg7[%c2, %c0_19] : memref<16x32xf32, #tpu.memory_space<vmem>>, vector<2x32xf32>
    tpu.vector_store %arg7[%c2, %c0_19], %95 {strides = array<i32>} : memref<16x32xf32, #tpu.memory_space<vmem>>, vector<2x32xf32>,
    %97 = vector.extract_strided_slice %94 {offsets = [0, 32], sizes = [2, 32], strides = [1, 1]} : vector<2x64xf32> to vector<2x32xf32>
    %c12 = arith.constant 12 : index
    %c0_20 = arith.constant 0 : index
    %98 = vector.load %arg8[%c12, %c0_20] : memref<16x32xf32, #tpu.memory_space<vmem>>, vector<2x32xf32>
    tpu.vector_store %arg8[%c12, %c0_20], %97 {strides = array<i32>} : memref<16x32xf32, #tpu.memory_space<vmem>>, vector<2x32xf32>,
    %99 = arith.truncf %94 : vector<2x64xf32> to vector<2x64xbf16>
    %cst_21 = arith.constant dense<0.000000e+00> : vector<2x256xf32>
    %100 = tpu.matmul %99, %50, %cst_21 {dimension_numbers = #tpu.dot_dimension_numbers<[1], [0], [0], [1], [0, 0, 1, 1], [], []>} : vector<2x64xbf16>, vector<64x256xbf16>, vector<2x256xf32> -> vector<2x256xf32>
    %101 = arith.addf %34, %100 : vector<2x256xf32>
    %102 = vector.extract_strided_slice %101 {offsets = [0, 0], sizes = [2, 192], strides = [1, 1]} : vector<2x256xf32> to vector<2x192xf32>
    %103 = arith.negf %102 : vector<2x192xf32>
    %104 = math.exp %103 : vector<2x192xf32>
    %cst_22 = arith.constant 1.000000e+00 : f32
    %105 = vector.broadcast %cst_22 : f32 to vector<2x192xf32>
    %106 = arith.addf %105, %104 : vector<2x192xf32>
    %107 = arith.divf %105, %106 : vector<2x192xf32>
    %108 = vector.extract_strided_slice %101 {offsets = [0, 192], sizes = [2, 64], strides = [1, 1]} : vector<2x256xf32> to vector<2x64xf32>
    %109 = math.tanh %108 : vector<2x64xf32>
    %110 = vector.extract_strided_slice %107 {offsets = [0, 0], sizes = [2, 64], strides = [1, 1]} : vector<2x192xf32> to vector<2x64xf32>
    %111 = vector.extract_strided_slice %107 {offsets = [0, 64], sizes = [2, 64], strides = [1, 1]} : vector<2x192xf32> to vector<2x64xf32>
    %112 = vector.extract_strided_slice %107 {offsets = [0, 128], sizes = [2, 64], strides = [1, 1]} : vector<2x192xf32> to vector<2x64xf32>
    %113 = arith.mulf %111, %92 : vector<2x64xf32>
    %114 = arith.mulf %110, %109 : vector<2x64xf32>
    %115 = arith.addf %113, %114 : vector<2x64xf32>
    %116 = math.tanh %115 : vector<2x64xf32>
    %117 = arith.mulf %112, %116 : vector<2x64xf32>
    %118 = vector.extract_strided_slice %117 {offsets = [0, 0], sizes = [2, 32], strides = [1, 1]} : vector<2x64xf32> to vector<2x32xf32>
    %c4 = arith.constant 4 : index
    %c0_23 = arith.constant 0 : index
    %119 = vector.load %arg7[%c4, %c0_23] : memref<16x32xf32, #tpu.memory_space<vmem>>, vector<2x32xf32>
    tpu.vector_store %arg7[%c4, %c0_23], %118 {strides = array<i32>} : memref<16x32xf32, #tpu.memory_space<vmem>>, vector<2x32xf32>,
    %120 = vector.extract_strided_slice %117 {offsets = [0, 32], sizes = [2, 32], strides = [1, 1]} : vector<2x64xf32> to vector<2x32xf32>
    %c10 = arith.constant 10 : index
    %c0_24 = arith.constant 0 : index
    %121 = vector.load %arg8[%c10, %c0_24] : memref<16x32xf32, #tpu.memory_space<vmem>>, vector<2x32xf32>
    tpu.vector_store %arg8[%c10, %c0_24], %120 {strides = array<i32>} : memref<16x32xf32, #tpu.memory_space<vmem>>, vector<2x32xf32>,
    %122 = arith.truncf %117 : vector<2x64xf32> to vector<2x64xbf16>
    %cst_25 = arith.constant dense<0.000000e+00> : vector<2x256xf32>
    %123 = tpu.matmul %122, %50, %cst_25 {dimension_numbers = #tpu.dot_dimension_numbers<[1], [0], [0], [1], [0, 0, 1, 1], [], []>} : vector<2x64xbf16>, vector<64x256xbf16>, vector<2x256xf32> -> vector<2x256xf32>
    %124 = arith.addf %37, %123 : vector<2x256xf32>
    %125 = vector.extract_strided_slice %124 {offsets = [0, 0], sizes = [2, 192], strides = [1, 1]} : vector<2x256xf32> to vector<2x192xf32>
    %126 = arith.negf %125 : vector<2x192xf32>
    %127 = math.exp %126 : vector<2x192xf32>
    %cst_26 = arith.constant 1.000000e+00 : f32
    %128 = vector.broadcast %cst_26 : f32 to vector<2x192xf32>
    %129 = arith.addf %128, %127 : vector<2x192xf32>
    %130 = arith.divf %128, %129 : vector<2x192xf32>
    %131 = vector.extract_strided_slice %124 {offsets = [0, 192], sizes = [2, 64], strides = [1, 1]} : vector<2x256xf32> to vector<2x64xf32>
    %132 = math.tanh %131 : vector<2x64xf32>
    %133 = vector.extract_strided_slice %130 {offsets = [0, 0], sizes = [2, 64], strides = [1, 1]} : vector<2x192xf32> to vector<2x64xf32>
    %134 = vector.extract_strided_slice %130 {offsets = [0, 64], sizes = [2, 64], strides = [1, 1]} : vector<2x192xf32> to vector<2x64xf32>
    %135 = vector.extract_strided_slice %130 {offsets = [0, 128], sizes = [2, 64], strides = [1, 1]} : vector<2x192xf32> to vector<2x64xf32>
    %136 = arith.mulf %134, %115 : vector<2x64xf32>
    %137 = arith.mulf %133, %132 : vector<2x64xf32>
    %138 = arith.addf %136, %137 : vector<2x64xf32>
    %139 = math.tanh %138 : vector<2x64xf32>
    %140 = arith.mulf %135, %139 : vector<2x64xf32>
    %141 = vector.extract_strided_slice %140 {offsets = [0, 0], sizes = [2, 32], strides = [1, 1]} : vector<2x64xf32> to vector<2x32xf32>
    %c6 = arith.constant 6 : index
    %c0_27 = arith.constant 0 : index
    %142 = vector.load %arg7[%c6, %c0_27] : memref<16x32xf32, #tpu.memory_space<vmem>>, vector<2x32xf32>
    tpu.vector_store %arg7[%c6, %c0_27], %141 {strides = array<i32>} : memref<16x32xf32, #tpu.memory_space<vmem>>, vector<2x32xf32>,
    %143 = vector.extract_strided_slice %140 {offsets = [0, 32], sizes = [2, 32], strides = [1, 1]} : vector<2x64xf32> to vector<2x32xf32>
    %c8 = arith.constant 8 : index
    %c0_28 = arith.constant 0 : index
    %144 = vector.load %arg8[%c8, %c0_28] : memref<16x32xf32, #tpu.memory_space<vmem>>, vector<2x32xf32>
    tpu.vector_store %arg8[%c8, %c0_28], %143 {strides = array<i32>} : memref<16x32xf32, #tpu.memory_space<vmem>>, vector<2x32xf32>,
    %145 = arith.truncf %140 : vector<2x64xf32> to vector<2x64xbf16>
    %cst_29 = arith.constant dense<0.000000e+00> : vector<2x256xf32>
    %146 = tpu.matmul %145, %50, %cst_29 {dimension_numbers = #tpu.dot_dimension_numbers<[1], [0], [0], [1], [0, 0, 1, 1], [], []>} : vector<2x64xbf16>, vector<64x256xbf16>, vector<2x256xf32> -> vector<2x256xf32>
    %147 = arith.addf %40, %146 : vector<2x256xf32>
    %148 = vector.extract_strided_slice %147 {offsets = [0, 0], sizes = [2, 192], strides = [1, 1]} : vector<2x256xf32> to vector<2x192xf32>
    %149 = arith.negf %148 : vector<2x192xf32>
    %150 = math.exp %149 : vector<2x192xf32>
    %cst_30 = arith.constant 1.000000e+00 : f32
    %151 = vector.broadcast %cst_30 : f32 to vector<2x192xf32>
    %152 = arith.addf %151, %150 : vector<2x192xf32>
    %153 = arith.divf %151, %152 : vector<2x192xf32>
    %154 = vector.extract_strided_slice %147 {offsets = [0, 192], sizes = [2, 64], strides = [1, 1]} : vector<2x256xf32> to vector<2x64xf32>
    %155 = math.tanh %154 : vector<2x64xf32>
    %156 = vector.extract_strided_slice %153 {offsets = [0, 0], sizes = [2, 64], strides = [1, 1]} : vector<2x192xf32> to vector<2x64xf32>
    %157 = vector.extract_strided_slice %153 {offsets = [0, 64], sizes = [2, 64], strides = [1, 1]} : vector<2x192xf32> to vector<2x64xf32>
    %158 = vector.extract_strided_slice %153 {offsets = [0, 128], sizes = [2, 64], strides = [1, 1]} : vector<2x192xf32> to vector<2x64xf32>
    %159 = arith.mulf %157, %138 : vector<2x64xf32>
    %160 = arith.mulf %156, %155 : vector<2x64xf32>
    %161 = arith.addf %159, %160 : vector<2x64xf32>
    %162 = math.tanh %161 : vector<2x64xf32>
    %163 = arith.mulf %158, %162 : vector<2x64xf32>
    %164 = vector.extract_strided_slice %163 {offsets = [0, 0], sizes = [2, 32], strides = [1, 1]} : vector<2x64xf32> to vector<2x32xf32>
    %c8_31 = arith.constant 8 : index
    %c0_32 = arith.constant 0 : index
    %165 = vector.load %arg7[%c8_31, %c0_32] : memref<16x32xf32, #tpu.memory_space<vmem>>, vector<2x32xf32>
    tpu.vector_store %arg7[%c8_31, %c0_32], %164 {strides = array<i32>} : memref<16x32xf32, #tpu.memory_space<vmem>>, vector<2x32xf32>,
    %166 = vector.extract_strided_slice %163 {offsets = [0, 32], sizes = [2, 32], strides = [1, 1]} : vector<2x64xf32> to vector<2x32xf32>
    %c6_33 = arith.constant 6 : index
    %c0_34 = arith.constant 0 : index
    %167 = vector.load %arg8[%c6_33, %c0_34] : memref<16x32xf32, #tpu.memory_space<vmem>>, vector<2x32xf32>
    tpu.vector_store %arg8[%c6_33, %c0_34], %166 {strides = array<i32>} : memref<16x32xf32, #tpu.memory_space<vmem>>, vector<2x32xf32>,
    %168 = arith.truncf %163 : vector<2x64xf32> to vector<2x64xbf16>
    %cst_35 = arith.constant dense<0.000000e+00> : vector<2x256xf32>
    %169 = tpu.matmul %168, %50, %cst_35 {dimension_numbers = #tpu.dot_dimension_numbers<[1], [0], [0], [1], [0, 0, 1, 1], [], []>} : vector<2x64xbf16>, vector<64x256xbf16>, vector<2x256xf32> -> vector<2x256xf32>
    %170 = arith.addf %43, %169 : vector<2x256xf32>
    %171 = vector.extract_strided_slice %170 {offsets = [0, 0], sizes = [2, 192], strides = [1, 1]} : vector<2x256xf32> to vector<2x192xf32>
    %172 = arith.negf %171 : vector<2x192xf32>
    %173 = math.exp %172 : vector<2x192xf32>
    %cst_36 = arith.constant 1.000000e+00 : f32
    %174 = vector.broadcast %cst_36 : f32 to vector<2x192xf32>
    %175 = arith.addf %174, %173 : vector<2x192xf32>
    %176 = arith.divf %174, %175 : vector<2x192xf32>
    %177 = vector.extract_strided_slice %170 {offsets = [0, 192], sizes = [2, 64], strides = [1, 1]} : vector<2x256xf32> to vector<2x64xf32>
    %178 = math.tanh %177 : vector<2x64xf32>
    %179 = vector.extract_strided_slice %176 {offsets = [0, 0], sizes = [2, 64], strides = [1, 1]} : vector<2x192xf32> to vector<2x64xf32>
    %180 = vector.extract_strided_slice %176 {offsets = [0, 64], sizes = [2, 64], strides = [1, 1]} : vector<2x192xf32> to vector<2x64xf32>
    %181 = vector.extract_strided_slice %176 {offsets = [0, 128], sizes = [2, 64], strides = [1, 1]} : vector<2x192xf32> to vector<2x64xf32>
    %182 = arith.mulf %180, %161 : vector<2x64xf32>
    %183 = arith.mulf %179, %178 : vector<2x64xf32>
    %184 = arith.addf %182, %183 : vector<2x64xf32>
    %185 = math.tanh %184 : vector<2x64xf32>
    %186 = arith.mulf %181, %185 : vector<2x64xf32>
    %187 = vector.extract_strided_slice %186 {offsets = [0, 0], sizes = [2, 32], strides = [1, 1]} : vector<2x64xf32> to vector<2x32xf32>
    %c10_37 = arith.constant 10 : index
    %c0_38 = arith.constant 0 : index
    %188 = vector.load %arg7[%c10_37, %c0_38] : memref<16x32xf32, #tpu.memory_space<vmem>>, vector<2x32xf32>
    tpu.vector_store %arg7[%c10_37, %c0_38], %187 {strides = array<i32>} : memref<16x32xf32, #tpu.memory_space<vmem>>, vector<2x32xf32>,
    %189 = vector.extract_strided_slice %186 {offsets = [0, 32], sizes = [2, 32], strides = [1, 1]} : vector<2x64xf32> to vector<2x32xf32>
    %c4_39 = arith.constant 4 : index
    %c0_40 = arith.constant 0 : index
    %190 = vector.load %arg8[%c4_39, %c0_40] : memref<16x32xf32, #tpu.memory_space<vmem>>, vector<2x32xf32>
    tpu.vector_store %arg8[%c4_39, %c0_40], %189 {strides = array<i32>} : memref<16x32xf32, #tpu.memory_space<vmem>>, vector<2x32xf32>,
    %191 = arith.truncf %186 : vector<2x64xf32> to vector<2x64xbf16>
    %cst_41 = arith.constant dense<0.000000e+00> : vector<2x256xf32>
    %192 = tpu.matmul %191, %50, %cst_41 {dimension_numbers = #tpu.dot_dimension_numbers<[1], [0], [0], [1], [0, 0, 1, 1], [], []>} : vector<2x64xbf16>, vector<64x256xbf16>, vector<2x256xf32> -> vector<2x256xf32>
    %193 = arith.addf %46, %192 : vector<2x256xf32>
    %194 = vector.extract_strided_slice %193 {offsets = [0, 0], sizes = [2, 192], strides = [1, 1]} : vector<2x256xf32> to vector<2x192xf32>
    %195 = arith.negf %194 : vector<2x192xf32>
    %196 = math.exp %195 : vector<2x192xf32>
    %cst_42 = arith.constant 1.000000e+00 : f32
    %197 = vector.broadcast %cst_42 : f32 to vector<2x192xf32>
    %198 = arith.addf %197, %196 : vector<2x192xf32>
    %199 = arith.divf %197, %198 : vector<2x192xf32>
    %200 = vector.extract_strided_slice %193 {offsets = [0, 192], sizes = [2, 64], strides = [1, 1]} : vector<2x256xf32> to vector<2x64xf32>
    %201 = math.tanh %200 : vector<2x64xf32>
    %202 = vector.extract_strided_slice %199 {offsets = [0, 0], sizes = [2, 64], strides = [1, 1]} : vector<2x192xf32> to vector<2x64xf32>
    %203 = vector.extract_strided_slice %199 {offsets = [0, 64], sizes = [2, 64], strides = [1, 1]} : vector<2x192xf32> to vector<2x64xf32>
    %204 = vector.extract_strided_slice %199 {offsets = [0, 128], sizes = [2, 64], strides = [1, 1]} : vector<2x192xf32> to vector<2x64xf32>
    %205 = arith.mulf %203, %184 : vector<2x64xf32>
    %206 = arith.mulf %202, %201 : vector<2x64xf32>
    %207 = arith.addf %205, %206 : vector<2x64xf32>
    %208 = math.tanh %207 : vector<2x64xf32>
    %209 = arith.mulf %204, %208 : vector<2x64xf32>
    %210 = vector.extract_strided_slice %209 {offsets = [0, 0], sizes = [2, 32], strides = [1, 1]} : vector<2x64xf32> to vector<2x32xf32>
    %c12_43 = arith.constant 12 : index
    %c0_44 = arith.constant 0 : index
    %211 = vector.load %arg7[%c12_43, %c0_44] : memref<16x32xf32, #tpu.memory_space<vmem>>, vector<2x32xf32>
    tpu.vector_store %arg7[%c12_43, %c0_44], %210 {strides = array<i32>} : memref<16x32xf32, #tpu.memory_space<vmem>>, vector<2x32xf32>,
    %212 = vector.extract_strided_slice %209 {offsets = [0, 32], sizes = [2, 32], strides = [1, 1]} : vector<2x64xf32> to vector<2x32xf32>
    %c2_45 = arith.constant 2 : index
    %c0_46 = arith.constant 0 : index
    %213 = vector.load %arg8[%c2_45, %c0_46] : memref<16x32xf32, #tpu.memory_space<vmem>>, vector<2x32xf32>
    tpu.vector_store %arg8[%c2_45, %c0_46], %212 {strides = array<i32>} : memref<16x32xf32, #tpu.memory_space<vmem>>, vector<2x32xf32>,
    %214 = arith.truncf %209 : vector<2x64xf32> to vector<2x64xbf16>
    %cst_47 = arith.constant dense<0.000000e+00> : vector<2x256xf32>
    %215 = tpu.matmul %214, %50, %cst_47 {dimension_numbers = #tpu.dot_dimension_numbers<[1], [0], [0], [1], [0, 0, 1, 1], [], []>} : vector<2x64xbf16>, vector<64x256xbf16>, vector<2x256xf32> -> vector<2x256xf32>
    %216 = arith.addf %49, %215 : vector<2x256xf32>
    %217 = vector.extract_strided_slice %216 {offsets = [0, 0], sizes = [2, 192], strides = [1, 1]} : vector<2x256xf32> to vector<2x192xf32>
    %218 = arith.negf %217 : vector<2x192xf32>
    %219 = math.exp %218 : vector<2x192xf32>
    %cst_48 = arith.constant 1.000000e+00 : f32
    %220 = vector.broadcast %cst_48 : f32 to vector<2x192xf32>
    %221 = arith.addf %220, %219 : vector<2x192xf32>
    %222 = arith.divf %220, %221 : vector<2x192xf32>
    %223 = vector.extract_strided_slice %216 {offsets = [0, 192], sizes = [2, 64], strides = [1, 1]} : vector<2x256xf32> to vector<2x64xf32>
    %224 = math.tanh %223 : vector<2x64xf32>
    %225 = vector.extract_strided_slice %222 {offsets = [0, 0], sizes = [2, 64], strides = [1, 1]} : vector<2x192xf32> to vector<2x64xf32>
    %226 = vector.extract_strided_slice %222 {offsets = [0, 64], sizes = [2, 64], strides = [1, 1]} : vector<2x192xf32> to vector<2x64xf32>
    %227 = vector.extract_strided_slice %222 {offsets = [0, 128], sizes = [2, 64], strides = [1, 1]} : vector<2x192xf32> to vector<2x64xf32>
    %228 = arith.mulf %226, %207 : vector<2x64xf32>
    %229 = arith.mulf %225, %224 : vector<2x64xf32>
    %230 = arith.addf %228, %229 : vector<2x64xf32>
    %231 = math.tanh %230 : vector<2x64xf32>
    %232 = arith.mulf %227, %231 : vector<2x64xf32>
    %233 = vector.extract_strided_slice %232 {offsets = [0, 0], sizes = [2, 32], strides = [1, 1]} : vector<2x64xf32> to vector<2x32xf32>
    %c14_49 = arith.constant 14 : index
    %c0_50 = arith.constant 0 : index
    %234 = vector.load %arg7[%c14_49, %c0_50] : memref<16x32xf32, #tpu.memory_space<vmem>>, vector<2x32xf32>
    tpu.vector_store %arg7[%c14_49, %c0_50], %233 {strides = array<i32>} : memref<16x32xf32, #tpu.memory_space<vmem>>, vector<2x32xf32>,
    %235 = vector.extract_strided_slice %232 {offsets = [0, 32], sizes = [2, 32], strides = [1, 1]} : vector<2x64xf32> to vector<2x32xf32>
    %c0_51 = arith.constant 0 : index
    %c0_52 = arith.constant 0 : index
    %236 = vector.load %arg8[%c0_51, %c0_52] : memref<16x32xf32, #tpu.memory_space<vmem>>, vector<2x32xf32>
    tpu.vector_store %arg8[%c0_51, %c0_52], %235 {strides = array<i32>} : memref<16x32xf32, #tpu.memory_space<vmem>>, vector<2x32xf32>,
    %c0_53 = arith.constant 0 : index
    %c0_54 = arith.constant 0 : index
    %237 = vector.load %arg7[%c0_53, %c0_54] : memref<16x32xf32, #tpu.memory_space<vmem>>, vector<16x32xf32>
    %c0_55 = arith.constant 0 : index
    %c0_56 = arith.constant 0 : index
    %238 = vector.load %arg8[%c0_55, %c0_56] : memref<16x32xf32, #tpu.memory_space<vmem>>, vector<16x32xf32>
    %239 = tpu.concatenate %237, %238 in 1 : vector<16x32xf32>, vector<16x32xf32> -> vector<16x64xf32>
    %240 = arith.truncf %239 : vector<16x64xf32> to vector<16x64xbf16>
    %c0_57 = arith.constant 0 : index
    %c0_58 = arith.constant 0 : index
    %241 = vector.load %arg4[%c0_57, %c0_58] : memref<64x16xbf16, #tpu.memory_space<vmem>>, vector<64x16xbf16>
    %cst_59 = arith.constant dense<0.000000e+00> : vector<16x16xf32>
    %242 = tpu.matmul %240, %241, %cst_59 {dimension_numbers = #tpu.dot_dimension_numbers<[1], [0], [0], [1], [0, 0, 1, 1], [], []>} : vector<16x64xbf16>, vector<64x16xbf16>, vector<16x16xf32> -> vector<16x16xf32>
    %c0_60 = arith.constant 0 : index
    %c0_61 = arith.constant 0 : index
    %243 = vector.load %arg5[%c0_60, %c0_61] : memref<1x16xf32, #tpu.memory_space<vmem>>, vector<1x16xf32>
    %244 = vector.broadcast %243 : vector<1x16xf32> to vector<16x16xf32>
    %245 = arith.addf %242, %244 : vector<16x16xf32>
    %c0_62 = arith.constant 0 : index
    %c0_63 = arith.constant 0 : index
    %246 = vector.load %arg6[%c0_62, %c0_63] : memref<16x16xf32, #tpu.memory_space<vmem>>, vector<16x16xf32>
    tpu.vector_store %arg6[%c0_62, %c0_63], %245 {strides = array<i32>} : memref<16x16xf32, #tpu.memory_space<vmem>>, vector<16x16xf32>,
    return
  }
}

</mosaic_0001>

<bundles_post_ra>
// kernel: bidirectional_lstm_forward.1
= control target key start
LH: loop header
LB: loop body
LE: loop exit
PB: predicated region body
PF: predicated region fallthrough
CT: control target
= control target key end

     0   :  { %11 = vsyncpa [#allocation5], 0  ;;  %s1675_s0 = inlined_call_operand.vmem [shape: f32[16,32], index: 0, kind: input, shape index: {}]   ;;  %s1676_s1 = inlined_call_operand.vmem [shape: bf16[32,256], index: 1, kind: input, shape index: {}]   ;;  %s1677_s2 = inlined_call_operand.vmem [shape: f32[1,256], index: 2, kind: input, shape index: {}]   ;;  %s1678_s3 = inlined_call_operand.hbm [shape: bf16[64,256], index: 3, kind: input, shape index: {}]   ;;  %s1679_s4 = inlined_call_operand.vmem [shape: bf16[64,16], index: 4, kind: input, shape index: {}]   ;;  %s1680_s5 = inlined_call_operand.vmem [shape: f32[1,16], index: 5, kind: input, shape index: {}]   ;;  %s1681_s6 = inlined_call_operand.hbm [shape: f32[16,16], index: 6, kind: output, shape index: {}]  }
   0x1   :  { %12 = vsyncpa [#allocation6], 0  ;;  %s1323_s21 = smov [#allocation4]   ;;  %s1275_s25 = scalar_lea.hbm %s1678_s3, 1024 }
   0x2   :  { %s24_s22 = sshll.u32 %s1323_s21, 4  ;;  %p1276_p0 = scmp.ne.s32.totalorder %s1678_s3, %s1275_s25  ;;  %s25_s22 = int_to_ptr.vmem [resolvable:$true] %s24_s22 }
   0x3   :  { %p1279_p1 = scmp.lt.u32.totalorder %s1275_s25, %s1678_s3 }
   0x5   :  { %p1281_p2 = pnand %p1279_p1, %p1276_p0 }
   0x7   :  { %1284 = shalt.err (!%p1281_p2)
}
   0x8   :  { %s1285_s30 = scalar_lea.vmem %s25_s22, 1024  ;;  %p1290_p4 = scmp.lt.s32.totalorder %s25_s22, %s25_s22 }
   0x9   :  { %p1286_p3 = scmp.ne.s32.totalorder %s25_s22, %s1285_s30  ;;  %p1291_p5 = scmp.lt.s32.totalorder %s1285_s30, %s1285_s30 }
   0xb   :  { %p1292_p6 = por %p1291_p5, %p1290_p4 }
   0xd   :  { %p1293_p7 = pnand %p1292_p6, %p1286_p3 }
   0xf   :  { %1296 = shalt.err (!%p1293_p7)
}
  0x10   :  { %s1324_s7 = smov 128   ;;  %s1325_s8 = smov 8  }
  0x11   :  { %30 = dma.hbm_to_vmem [thread:$0]  %s1678_s3, 1024, %s25_s22, [#allocation5], %s1324_s7, %s1324_s7, %s1325_s8  }
  0x12   :  { %1319 = dma.done.wait [#allocation5], 1024  }
  0x13   :  { %1320 = vsyncadd [#allocation5], 4294966272  ;;  %v1326_v0 = vmov 0   ;;  %v1157_v1 = vld [vmem:[%s1676_s1 + $0x4] ss:$8 sps:$4 sm:$0xff]   ;;  %vm78_vm0 = vcmask 261120   ;;  %v48_v16 = vlaneseq }
  0x14   :  { %114 = vmatprep.mubr.bf16.mxu0 %v1326_v0  ;;  %266 = vmatprep.mubr.bf16.mxu1 %v1326_v0  ;;  %v1388_v2 = vld [vmem:[#allocation4 + $0x4] ss:$8 sps:$4 sm:$0xff]   ;;  %v1161_v3 = vld [vmem:[%s1676_s1] ss:$8 sps:$4 sm:$0xff]   ;;  %v1163_v5 = vld [vmem:[%s1676_s1 + $0x14] ss:$8 sps:$4 sm:$0xff]  }
  0x15   :  { %82 = vmatprep.subr.bf16.mxu0 %v1157_v1  ;;  %v1393_v4 = vld [vmem:[#allocation4] ss:$8 sps:$4 sm:$0xff]   ;;  %234 = vmatprep.subr.bf16.mxu1 %v1388_v2  ;;  %v1400_v6 = vld [vmem:[#allocation4 + $0x14] ss:$8 sps:$4 sm:$0xff]   ;;  %v1167_v7 = vld [vmem:[%s1676_s1 + $0x10] ss:$8 sps:$4 sm:$0xff]  }
  0x16   :  { %83 = vmatpush1.bf16.msra.mxu0 %v1161_v3  ;;  %235 = vmatpush1.bf16.msra.mxu1 %v1393_v4  ;;  %v1405_v8 = vld [vmem:[#allocation4 + $0x10] ss:$8 sps:$4 sm:$0xff]   ;;  %v39_v9 = vld [vmem:[%s1675_s0] sm:$0xff]  ;;  %v40_v10 = vld [vmem:[%s1675_s0 + $0x8] sm:$0xff]  ;;  %v49_v17 = vshrl.u32 %v48_v16, 7  ;;  %v126_v18 = vand.u32 127, %v48_v16 }
  0x17   :  { %84 = vmatprep.subr.bf16.mxu0 %v1163_v5  ;;  %236 = vmatprep.subr.bf16.mxu1 %v1400_v6  ;;  %v1414_v11 = vld [vmem:[#allocation4 + $0x24] ss:$8 sps:$4 sm:$0xff]   ;;  %v41_v12 = vpack.c.bf16 %v40_v10, %v39_v9  ;;  %v1417_v13 = vld [vmem:[#allocation4 + $0x20] ss:$8 sps:$4 sm:$0xff]   ;;  %v1419_v14 = vld [vmem:[#allocation4 + $0x34] ss:$8 sps:$4 sm:$0xff]  }
  0x18   :  { %v1425_v15 = vld [vmem:[#allocation4 + $0x30] ss:$8 sps:$4 sm:$0xff]   ;;  %v50_v19 = vsub.s32 0, %v49_v17  ;;  %v46_v20 = vld [vmem:[%s1677_s2] sm:$0x3]  ;;  %v54_v21 = vsub.s32 1, %v49_v17 }
  0x19   :  { %v127_v22 = vadd.s32 128, %v126_v18  ;;  %v132_v25 = vand.u32 63, %v126_v18  ;;  %s1327_s2 = smov 64   ;;  %vm307_vm3 = vcmask 254976   ;;  %vm230_vm4 = vcmask 523264   ;;  %s1328_s22 = smov 96  }
  0x1a   :  { %85 = vmatpush1.bf16.msra.mxu0 %v1167_v7  ;;  %237 = vmatpush1.bf16.msra.mxu1 %v1405_v8  ;;  %v51_v23 = vrot.slane %v46_v20, %v50_v19  ;;  %v55_v24 = vrot.slane %v46_v20, %v54_v21  ;;  %vm400_vm5 = vcmask 257026   ;;  %vm495_vm6 = vcmask 259076   ;;  %s1331_s9 = smov 32   ;;  %s1332_s11 = smov [#allocation7]  }
  0x1b   :  { %238 = vmatprep.subr.bf16.mxu1 %v1414_v11  ;;  %318 = vmatprep.subr.bf16.mxu0 %v1388_v2  ;;  %v139_v26 = vand.u32 63, %v127_v22  ;;  %vm1452_vm1 = vcmp.lt.s32.totalorder %v132_v25, 32  ;;  %vm590_vm7 = vcmask 261126   ;;  %vm1330_vm8 = vmmov 0   ;;  %s1071_s12 = sshll.u32 %s1332_s11, 4  ;;  %s1072_s12 = int_to_ptr.vmem [resolvable:$true] %s1071_s12 }
  0x1c   :  { %vm1063_vm9 = vcmask 130048   ;;  %s1297_s13 = scalar_lea.vmem %s1072_s12, 256  ;;  %p1302_p9 = scmp.lt.s32.totalorder %s1072_s12, %s1072_s12 }
  0x1d   :  { %1087 = vmatmul.mubr.msk.bf16.vlgmr.msra.gmra.mrb[0].mxu0 %vm78_vm0, %v41_v12  ;;  %vm1456_vm2 = vcmp.lt.s32.totalorder %v139_v26, 32  ;;  %p1298_p8 = scmp.ne.s32.totalorder %s1072_s12, %s1297_s13  ;;  %p1303_p10 = scmp.lt.s32.totalorder %s1297_s13, %s1297_s13 }
  0x1e   :  { %239 = vmatpush1.bf16.msra.mxu1 %v1417_v13  ;;  %319 = vmatpush1.bf16.msra.mxu0 %v1393_v4 }
  0x1f   :  { %240 = vmatprep.subr.bf16.mxu1 %v1419_v14  ;;  %320 = vmatprep.subr.bf16.mxu0 %v1400_v6  ;;  %p1304_p11 = por %p1303_p10, %p1302_p9 }
  0x20   :  { %350 = vmatprep.mubr.bf16.mxu0 %v1326_v0 }
  0x21   :  { %p1305_p12 = pnand %p1304_p11, %p1298_p8 }
  0x22   :  { %241 = vmatpush1.bf16.msra.mxu1 %v1425_v15  ;;  %321 = vmatpush1.bf16.msra.mxu0 %v1405_v8 }
  0x23   :  { %322 = vmatprep.subr.bf16.mxu0 %v1414_v11  ;;  %413 = vmatprep.subr.bf16.mxu1 %v1388_v2 }
  0x25   :  { %267 = vmatmul.mubr.bf16.vlgmr.msra.gmra.mrb[0].mxu1 %v1326_v0 }
  0x26   :  { %323 = vmatpush1.bf16.msra.mxu0 %v1417_v13  ;;  %414 = vmatpush1.bf16.msra.mxu1 %v1393_v4 }
  0x27   :  { %324 = vmatprep.subr.bf16.mxu0 %v1419_v14  ;;  %415 = vmatprep.subr.bf16.mxu1 %v1400_v6 }
  0x28   :  { %445 = vmatprep.mubr.bf16.mxu1 %v1326_v0 }
  0x2a   :  { %325 = vmatpush1.bf16.msra.mxu0 %v1425_v15  ;;  %416 = vmatpush1.bf16.msra.mxu1 %v1405_v8 }
  0x2b   :  { %417 = vmatprep.subr.bf16.mxu1 %v1414_v11  ;;  %508 = vmatprep.subr.bf16.mxu0 %v1388_v2 }
  0x2e   :  { %418 = vmatpush1.bf16.msra.mxu1 %v1417_v13 }
  0x2f   :  { %419 = vmatprep.subr.bf16.mxu1 %v1419_v14 }
  0x32   :  { %420 = vmatpush1.bf16.msra.mxu1 %v1425_v15 }
  0x33   :  { %603 = vmatprep.subr.bf16.mxu1 %v1388_v2 }
  0xf0   :  { %v116_v27 = vpop.f32.mrb[0].mxu0 }
  0xf1   :  { %v117_v28 = vadd.f32 %v116_v27, %v51_v23  ;;  %v118_v29 = vpop.f32.mrb[1].mxu0 }
  0xf2   :  { %v119_v30 = vadd.f32 %v118_v29, %v55_v24  ;;  %v120_v31 = vpop.f32.mrb[2].mxu0 }
  0xf3   :  { %v121_v33 = vadd.f32 %v120_v31, %v51_v23  ;;  %v122_v34 = vpop.f32.mrb[3].mxu0  ;;  %v170_v36 = vrot.slane %v117_v28, 6  ;;  %v176_v37 = vrot.slane %v117_v28, 2 }
  0xf4   :  { %v123_v38 = vadd.f32 %v122_v34, %v55_v24  ;;  %v171_v39 = vrot.slane %v119_v30, 6  ;;  %v177_v40 = vrot.slane %v119_v30, 2 }
  0xf5   :  { %v156_v41 = vrot.slane %v121_v33, 6  ;;  %v162_v42 = vrot.slane %v121_v33, 2  ;;  %v1462_v43 = vsel %vm1452_vm1, %v121_v33, %v170_v36  ;;  %v1466_v44 = vsel %vm1452_vm1, %v121_v33, %v176_v37 }
  0xf6   :  { %v157_v45 = vrot.slane %v123_v38, 6  ;;  %v163_v46 = vrot.slane %v123_v38, 2  ;;  %v1470_v47 = vsel %vm1456_vm2, %v123_v38, %v171_v39  ;;  %v1474_v48 = vsel %vm1456_vm2, %v123_v38, %v177_v40 }
  0xf7   :  { %v1478_v49 = vsel %vm1452_vm1, %v117_v28, %v156_v41  ;;  %v1482_v50 = vsel %vm1452_vm1, %v117_v28, %v162_v42 }
  0xf8   :  { %v268_v51 = vpop.f32.mrb[0].mxu1  ;;  %v1486_v52 = vsel %vm1456_vm2, %v119_v30, %v157_v45  ;;  %v1490_v53 = vsel %vm1456_vm2, %v119_v30, %v163_v46 }
  0xf9   :  { %v270_v54 = vpop.f32.mrb[1].mxu1  ;;  %v275_v59 = vadd.f32 %v268_v51, %v1478_v49 }
  0xfa   :  { %v276_v55 = vadd.f32 %v270_v54, %v1486_v52  ;;  %v272_v56 = vpop.f32.mrb[2].mxu1 }
  0xfb   :  { %v273_v57 = vpop.f32.mrb[3].mxu1  ;;  %v1096_v60 = vmul.f32 -1.442695, %v275_v59 }
  0xfc   :  { %1179 = vtanh.f32 %v276_v55  ;;  %v1097_v12 = vmul.f32 -1.442695, %v276_v55 }
  0xfd   :  { %1181 = vpow2.f32 %v1096_v60 }
 0x106   :  { %v1180_v58 = vpop.eup %1179 }
 0x107   :  { %292 = vrot.lane.b32.xlu0 %v1180_v58, %s1327_s2  ;;  %v1182_v61 = vpop.eup %1181 }
 0x108   :  { %v283_v62 = vadd.f32 1.0, %v1182_v61 }
 0x10a   :  { %1183 = vrcp.f32 %v283_v62 }
 0x114   :  { %v1184_v63 = vpop.eup %1183 }
 0x115   :  { %v290_v5 = vmul.f32 0.0, %v1184_v63 }
 0x179   :  { %v293_v1 = vpop.permute.xlu0 %292 }
 0x17a   :  { %v295_v3 = vmul.f32 %v1184_v63, %v293_v1 }
 0x17c   :  { %297 = vrot.lane.b32.xlu0 %v295_v3, %s1327_s2 }
 0x1ee   :  { %v298_v7 = vpop.permute.xlu0 %297 }
 0x1ef   :  { %v300_v9 = vadd.f32 %v298_v7, %v290_v5 }
 0x1f1   :  { %1185 = vtanh.f32 %v300_v9  ;;  %v381_v37 = vrot.slane %v300_v9, 6 }
 0x1f2   :  { %1187 = vpow2.f32 %v1097_v12 }
 0x1fb   :  { %v1186_v10 = vpop.eup %1185 }
 0x1fc   :  { %303 = vrot.lane.b32.xlu1 %v1186_v10, %s1327_s2  ;;  %v1188_v16 = vpop.eup %1187 }
 0x1fd   :  { %v284_v17 = vadd.f32 1.0, %v1188_v16 }
 0x1ff   :  { %1189 = vrcp.f32 %v284_v17 }
 0x209   :  { %v1190_v18 = vpop.eup %1189 }
 0x26e   :  { %v304_v19 = vpop.permute.xlu1 %303 }
 0x26f   :  { %v1497_v20 = vmul.f32 %v1190_v18, %v304_v19 }
 0x271   :  { %308 = vst.msk [vmem:[#allocation2] sm:$0x3] %vm307_vm3, %v1497_v20  ;;  %v314_v21 = vpack.c.bf16 %v1497_v20, %v1497_v20 }
 0x273   :  { %1098 = vmatmul.mubr.msk.bf16.vlgmr.msra.gmra.mrb[4].mxu0 %vm230_vm4, %v314_v21 }
 0x274   :  { %509 = vmatpush1.bf16.msra.mxu0 %v1393_v4  ;;  %540 = vmatprep.mubr.bf16.mxu0 %v1326_v0 }
 0x275   :  { %510 = vmatprep.subr.bf16.mxu0 %v1400_v6 }
 0x278   :  { %511 = vmatpush1.bf16.msra.mxu0 %v1405_v8 }
 0x279   :  { %512 = vmatprep.subr.bf16.mxu0 %v1414_v11 }
 0x27c   :  { %513 = vmatpush1.bf16.msra.mxu0 %v1417_v13 }
 0x27d   :  { %514 = vmatprep.subr.bf16.mxu0 %v1419_v14 }
 0x280   :  { %515 = vmatpush1.bf16.msra.mxu0 %v1425_v15 }
 0x281   :  { %689 = vmatprep.subr.bf16.mxu0 %v1388_v2 }
 0x346   :  { %v352_v22 = vpop.f32.mrb[4].mxu0 }
 0x347   :  { %v354_v23 = vpop.f32.mrb[5].mxu0  ;;  %v361_v29 = vrot.slane %v352_v22, 6 }
 0x348   :  { %v362_v24 = vrot.slane %v354_v23, 6  ;;  %v356_v25 = vpop.f32.mrb[6].mxu0 }
 0x349   :  { %v357_v26 = vpop.f32.mrb[7].mxu0  ;;  %v365_v30 = vadd.f32 %v361_v29, %v1482_v50 }
 0x34a   :  { %v366_v27 = vadd.f32 %v362_v24, %v1490_v53 }
 0x34b   :  { %v1099_v31 = vmul.f32 -1.442695, %v365_v30 }
 0x34c   :  { %1191 = vtanh.f32 %v366_v27  ;;  %v1100_v42 = vmul.f32 -1.442695, %v366_v27 }
 0x34d   :  { %1193 = vpow2.f32 %v1099_v31 }
 0x356   :  { %v1192_v28 = vpop.eup %1191 }
 0x357   :  { %385 = vrot.lane.b32.xlu1 %v1192_v28, %s1327_s2  ;;  %v1194_v32 = vpop.eup %1193 }
 0x358   :  { %v373_v33 = vadd.f32 1.0, %v1194_v32 }
 0x35a   :  { %1195 = vrcp.f32 %v373_v33 }
 0x364   :  { %v1196_v34 = vpop.eup %1195 }
 0x365   :  { %v383_v38 = vmul.f32 %v1196_v34, %v381_v37 }
 0x3c9   :  { %v386_v35 = vpop.permute.xlu1 %385 }
 0x3ca   :  { %v388_v36 = vmul.f32 %v1196_v34, %v386_v35 }
 0x3cc   :  { %390 = vrot.lane.b32.xlu0 %v388_v36, %s1327_s2 }
 0x43e   :  { %v391_v39 = vpop.permute.xlu0 %390 }
 0x43f   :  { %v393_v40 = vadd.f32 %v391_v39, %v383_v38 }
 0x441   :  { %1197 = vtanh.f32 %v393_v40  ;;  %v476_v18 = vrot.slane %v393_v40, 6 }
 0x442   :  { %1199 = vpow2.f32 %v1100_v42 }
 0x44b   :  { %v1198_v41 = vpop.eup %1197 }
 0x44c   :  { %396 = vrot.lane.b32.xlu1 %v1198_v41, %s1327_s2  ;;  %v1200_v45 = vpop.eup %1199 }
 0x44d   :  { %v374_v46 = vadd.f32 1.0, %v1200_v45 }
 0x44f   :  { %1201 = vrcp.f32 %v374_v46 }
 0x459   :  { %v1202_v51 = vpop.eup %1201 }
 0x4be   :  { %v397_v54 = vpop.permute.xlu1 %396 }
 0x4bf   :  { %v1518_v55 = vmul.f32 %v1202_v51, %v397_v54 }
 0x4c1   :  { %401 = vst.msk [vmem:[#allocation2] sm:$0xc] %vm400_vm5, %v1518_v55  ;;  %v407_v56 = vpack.c.bf16 %v1518_v55, %v1518_v55 }
 0x4c3   :  { %v409_v57 = vrot.slane %v407_v56, 1 }
 0x4c5   :  { %1101 = vmatmul.mubr.msk.bf16.vlgmr.msra.gmra.mrb[4].mxu1 %vm230_vm4, %v409_v57 }
 0x4c6   :  { %604 = vmatpush1.bf16.msra.mxu1 %v1393_v4  ;;  %635 = vmatprep.mubr.bf16.mxu1 %v1326_v0 }
 0x4c7   :  { %605 = vmatprep.subr.bf16.mxu1 %v1400_v6 }
 0x4ca   :  { %606 = vmatpush1.bf16.msra.mxu1 %v1405_v8 }
 0x4cb   :  { %607 = vmatprep.subr.bf16.mxu1 %v1414_v11 }
 0x4ce   :  { %608 = vmatpush1.bf16.msra.mxu1 %v1417_v13 }
 0x4cf   :  { %609 = vmatprep.subr.bf16.mxu1 %v1419_v14 }
 0x4d2   :  { %610 = vmatpush1.bf16.msra.mxu1 %v1425_v15 }
 0x4d3   :  { %783 = vmatprep.subr.bf16.mxu1 %v1388_v2 }
 0x598   :  { %v447_v58 = vpop.f32.mrb[4].mxu1 }
 0x599   :  { %v449_v59 = vpop.f32.mrb[5].mxu1  ;;  %v456_v3 = vrot.slane %v447_v58, 4 }
 0x59a   :  { %v457_v60 = vrot.slane %v449_v59, 4  ;;  %v451_v61 = vpop.f32.mrb[6].mxu1 }
 0x59b   :  { %v452_v62 = vpop.f32.mrb[7].mxu1  ;;  %v460_v5 = vadd.f32 %v456_v3, %v1478_v49 }
 0x59c   :  { %v461_v63 = vadd.f32 %v457_v60, %v1486_v52 }
 0x59d   :  { %v1102_v7 = vmul.f32 -1.442695, %v460_v5 }
 0x59e   :  { %1203 = vtanh.f32 %v461_v63  ;;  %v1103_v23 = vmul.f32 -1.442695, %v461_v63 }
 0x59f   :  { %1205 = vpow2.f32 %v1102_v7 }
 0x5a8   :  { %v1204_v1 = vpop.eup %1203 }
 0x5a9   :  { %480 = vrot.lane.b32.xlu0 %v1204_v1, %s1327_s2  ;;  %v1206_v9 = vpop.eup %1205 }
 0x5aa   :  { %v468_v10 = vadd.f32 1.0, %v1206_v9 }
 0x5ac   :  { %1207 = vrcp.f32 %v468_v10 }
 0x5b6   :  { %v1208_v12 = vpop.eup %1207 }
 0x5b7   :  { %v478_v19 = vmul.f32 %v1208_v12, %v476_v18 }
 0x61b   :  { %v481_v16 = vpop.permute.xlu0 %480 }
 0x61c   :  { %v483_v17 = vmul.f32 %v1208_v12, %v481_v16 }
 0x61e   :  { %485 = vrot.lane.b32.xlu1 %v483_v17, %s1327_s2 }
 0x690   :  { %v486_v52 = vpop.permute.xlu1 %485 }
 0x691   :  { %v488_v21 = vadd.f32 %v486_v52, %v478_v19 }
 0x693   :  { %1209 = vtanh.f32 %v488_v21  ;;  %v571_v46 = vrot.slane %v488_v21, 6 }
 0x694   :  { %1211 = vpow2.f32 %v1103_v23 }
 0x69d   :  { %v1210_v22 = vpop.eup %1209 }
 0x69e   :  { %491 = vrot.lane.b32.xlu0 %v1210_v22, %s1327_s2  ;;  %v1212_v49 = vpop.eup %1211 }
 0x69f   :  { %v469_v24 = vadd.f32 1.0, %v1212_v49 }
 0x6a1   :  { %1213 = vrcp.f32 %v469_v24 }
 0x6ab   :  { %v1214_v25 = vpop.eup %1213 }
 0x710   :  { %v492_v26 = vpop.permute.xlu0 %491 }
 0x711   :  { %v1539_v27 = vmul.f32 %v1214_v25, %v492_v26 }
 0x713   :  { %496 = vst.msk [vmem:[#allocation2] sm:$0x30] %vm495_vm6, %v1539_v27  ;;  %v502_v28 = vpack.c.bf16 %v1539_v27, %v1539_v27 }
 0x715   :  { %v504_v29 = vrot.slane %v502_v28, 2 }
 0x717   :  { %1104 = vmatmul.mubr.msk.bf16.vlgmr.msra.gmra.mrb[8].mxu0 %vm230_vm4, %v504_v29 }
 0x718   :  { %690 = vmatpush1.bf16.msra.mxu0 %v1393_v4  ;;  %721 = vmatprep.mubr.bf16.mxu0 %v1326_v0 }
 0x719   :  { %691 = vmatprep.subr.bf16.mxu0 %v1400_v6 }
 0x71c   :  { %692 = vmatpush1.bf16.msra.mxu0 %v1405_v8 }
 0x71d   :  { %693 = vmatprep.subr.bf16.mxu0 %v1414_v11 }
 0x720   :  { %694 = vmatpush1.bf16.msra.mxu0 %v1417_v13 }
 0x721   :  { %695 = vmatprep.subr.bf16.mxu0 %v1419_v14 }
 0x724   :  { %696 = vmatpush1.bf16.msra.mxu0 %v1425_v15 }
 0x725   :  { %877 = vmatprep.subr.bf16.mxu0 %v1388_v2 }
 0x7ea   :  { %v542_v30 = vpop.f32.mrb[8].mxu0 }
 0x7eb   :  { %v544_v31 = vpop.f32.mrb[9].mxu0  ;;  %v551_v37 = vrot.slane %v542_v30, 2 }
 0x7ec   :  { %v552_v32 = vrot.slane %v544_v31, 2  ;;  %v546_v33 = vpop.f32.mrb[10].mxu0 }
 0x7ed   :  { %v547_v34 = vpop.f32.mrb[11].mxu0  ;;  %v555_v38 = vadd.f32 %v551_v37, %v1482_v50 }
 0x7ee   :  { %v556_v35 = vadd.f32 %v552_v32, %v1490_v53 }
 0x7ef   :  { %v1105_v39 = vmul.f32 -1.442695, %v555_v38 }
 0x7f0   :  { %1215 = vtanh.f32 %v556_v35  ;;  %v1106_v57 = vmul.f32 -1.442695, %v556_v35 }
 0x7f1   :  { %1217 = vpow2.f32 %v1105_v39 }
 0x7fa   :  { %v1216_v36 = vpop.eup %1215 }
 0x7fb   :  { %575 = vrot.lane.b32.xlu1 %v1216_v36, %s1327_s2  ;;  %v1218_v40 = vpop.eup %1217 }
 0x7fc   :  { %v563_v41 = vadd.f32 1.0, %v1218_v40 }
 0x7fe   :  { %1219 = vrcp.f32 %v563_v41 }
 0x808   :  { %v1220_v2 = vpop.eup %1219 }
 0x809   :  { %v573_v51 = vmul.f32 %v1220_v2, %v571_v46 }
 0x86d   :  { %v576_v42 = vpop.permute.xlu1 %575 }
 0x86e   :  { %v578_v45 = vmul.f32 %v1220_v2, %v576_v42 }
 0x870   :  { %580 = vrot.lane.b32.xlu0 %v578_v45, %s1327_s2 }
 0x8e2   :  { %v581_v53 = vpop.permute.xlu0 %580 }
 0x8e3   :  { %v583_v54 = vadd.f32 %v581_v53, %v573_v51 }
 0x8e5   :  { %1221 = vtanh.f32 %v583_v54  ;;  %v660_v22 = vrot.slane %v583_v54, 6 }
 0x8e6   :  { %1223 = vpow2.f32 %v1106_v57 }
 0x8ef   :  { %v1222_v56 = vpop.eup %1221 }
 0x8f0   :  { %586 = vrot.lane.b32.xlu1 %v1222_v56, %s1327_s2  ;;  %v1224_v50 = vpop.eup %1223 }
 0x8f1   :  { %v564_v58 = vadd.f32 1.0, %v1224_v50 }
 0x8f3   :  { %1225 = vrcp.f32 %v564_v58 }
 0x8fd   :  { %v1226_v59 = vpop.eup %1225 }
 0x962   :  { %v587_v60 = vpop.permute.xlu1 %586 }
 0x963   :  { %v1560_v61 = vmul.f32 %v1226_v59, %v587_v60 }
 0x965   :  { %591 = vst.msk [vmem:[#allocation2] sm:$0xc0] %vm590_vm7, %v1560_v61  ;;  %v597_v62 = vpack.c.bf16 %v1560_v61, %v1560_v61 }
 0x967   :  { %v599_v63 = vrot.slane %v597_v62, 3 }
 0x969   :  { %1107 = vmatmul.mubr.msk.bf16.vlgmr.msra.gmra.mrb[8].mxu1 %vm230_vm4, %v599_v63 }
 0x96a   :  { %784 = vmatpush1.bf16.msra.mxu1 %v1393_v4  ;;  %815 = vmatprep.mubr.bf16.mxu1 %v1326_v0 }
 0x96b   :  { %785 = vmatprep.subr.bf16.mxu1 %v1400_v6 }
 0x96e   :  { %786 = vmatpush1.bf16.msra.mxu1 %v1405_v8 }
 0x96f   :  { %787 = vmatprep.subr.bf16.mxu1 %v1414_v11 }
 0x972   :  { %788 = vmatpush1.bf16.msra.mxu1 %v1417_v13 }
 0x973   :  { %789 = vmatprep.subr.bf16.mxu1 %v1419_v14 }
 0x976   :  { %790 = vmatpush1.bf16.msra.mxu1 %v1425_v15 }
 0xa3c   :  { %v637_v1 = vpop.f32.mrb[8].mxu1 }
 0xa3d   :  { %v639_v3 = vpop.f32.mrb[9].mxu1  ;;  %v644_v12 = vadd.f32 %v637_v1, %v1462_v43 }
 0xa3e   :  { %v645_v5 = vadd.f32 %v639_v3, %v1470_v47  ;;  %v641_v7 = vpop.f32.mrb[10].mxu1 }
 0xa3f   :  { %v642_v9 = vpop.f32.mrb[11].mxu1  ;;  %v1108_v16 = vmul.f32 -1.442695, %v644_v12 }
 0xa40   :  { %1227 = vtanh.f32 %v645_v5  ;;  %v1109_v26 = vmul.f32 -1.442695, %v645_v5 }
 0xa41   :  { %1229 = vpow2.f32 %v1108_v16 }
 0xa4a   :  { %v1228_v10 = vpop.eup %1227 }
 0xa4b   :  { %664 = vrot.lane.b32.xlu0 %v1228_v10, %s1327_s2  ;;  %v1230_v17 = vpop.eup %1229 }
 0xa4c   :  { %v652_v18 = vadd.f32 1.0, %v1230_v17 }
 0xa4e   :  { %1231 = vrcp.f32 %v652_v18 }
 0xa58   :  { %v1232_v19 = vpop.eup %1231 }
 0xa59   :  { %v662_v23 = vmul.f32 %v1232_v19, %v660_v22 }
 0xabd   :  { %v665_v52 = vpop.permute.xlu0 %664 }
 0xabe   :  { %v667_v21 = vmul.f32 %v1232_v19, %v665_v52 }
 0xac0   :  { %669 = vrot.lane.b32.xlu1 %v667_v21, %s1327_s2 }
 0xb32   :  { %v670_v49 = vpop.permute.xlu1 %669 }
 0xb33   :  { %v672_v24 = vadd.f32 %v670_v49, %v662_v23 }
 0xb35   :  { %1233 = vtanh.f32 %v672_v24  ;;  %v752_v41 = vrot.slane %v672_v24, 6 }
 0xb36   :  { %1235 = vpow2.f32 %v1109_v26 }
 0xb3f   :  { %v1234_v25 = vpop.eup %1233 }
 0xb40   :  { %675 = vrot.lane.b32.xlu0 %v1234_v25, %s1327_s2  ;;  %v1236_v28 = vpop.eup %1235 }
 0xb41   :  { %v653_v29 = vadd.f32 1.0, %v1236_v28 }
 0xb43   :  { %1237 = vrcp.f32 %v653_v29 }
 0xb4d   :  { %v1238_v30 = vpop.eup %1237 }
 0xbb2   :  { %v676_v31 = vpop.permute.xlu0 %675 }
 0xbb3   :  { %v1580_v32 = vmul.f32 %v1238_v30, %v676_v31 }
 0xbb5   :  { %679 = vst.msk [vmem:[#allocation2 + $0x8] sm:$0x3] %vm307_vm3, %v1580_v32  ;;  %v685_v33 = vpack.c.bf16 %v1580_v32, %v1580_v32 }
 0xbb7   :  { %1110 = vmatmul.mubr.msk.bf16.vlgmr.msra.gmra.mrb[12].mxu0 %vm230_vm4, %v685_v33 }
 0xbb8   :  { %878 = vmatpush1.bf16.msra.mxu0 %v1393_v4  ;;  %909 = vmatprep.mubr.bf16.mxu0 %v1326_v0 }
 0xbb9   :  { %879 = vmatprep.subr.bf16.mxu0 %v1400_v6 }
 0xbbc   :  { %880 = vmatpush1.bf16.msra.mxu0 %v1405_v8 }
 0xbbd   :  { %881 = vmatprep.subr.bf16.mxu0 %v1414_v11 }
 0xbc0   :  { %882 = vmatpush1.bf16.msra.mxu0 %v1417_v13 }
 0xbc1   :  { %883 = vmatprep.subr.bf16.mxu0 %v1419_v14 }
 0xbc4   :  { %884 = vmatpush1.bf16.msra.mxu0 %v1425_v15 }
 0xc8a   :  { %v723_v34 = vpop.f32.mrb[12].mxu0 }
 0xc8b   :  { %v725_v35 = vpop.f32.mrb[13].mxu0  ;;  %v732_v6 = vrot.slane %v723_v34, 6 }
 0xc8c   :  { %v733_v36 = vrot.slane %v725_v35, 6  ;;  %v727_v37 = vpop.f32.mrb[14].mxu0 }
 0xc8d   :  { %v728_v38 = vpop.f32.mrb[15].mxu0  ;;  %v736_v8 = vadd.f32 %v732_v6, %v1466_v44 }
 0xc8e   :  { %v737_v4 = vadd.f32 %v733_v36, %v1474_v48 }
 0xc8f   :  { %v1111_v11 = vmul.f32 -1.442695, %v736_v8 }
 0xc90   :  { %1239 = vtanh.f32 %v737_v4  ;;  %v1112_v51 = vmul.f32 -1.442695, %v737_v4 }
 0xc91   :  { %1241 = vpow2.f32 %v1111_v11 }
 0xc9a   :  { %v1240_v0 = vpop.eup %1239 }
 0xc9b   :  { %756 = vrot.lane.b32.xlu1 %v1240_v0, %s1327_s2  ;;  %v1242_v13 = vpop.eup %1241 }
 0xc9c   :  { %v744_v14 = vadd.f32 1.0, %v1242_v13 }
 0xc9e   :  { %1243 = vrcp.f32 %v744_v14 }
 0xca8   :  { %v1244_v15 = vpop.eup %1243 }
 0xca9   :  { %v754_v2 = vmul.f32 %v1244_v15, %v752_v41 }
 0xd0d   :  { %v757_v39 = vpop.permute.xlu1 %756 }
 0xd0e   :  { %v759_v40 = vmul.f32 %v1244_v15, %v757_v39 }
 0xd10   :  { %761 = vrot.lane.b32.xlu0 %v759_v40, %s1327_s2 }
 0xd82   :  { %v762_v42 = vpop.permute.xlu0 %761 }
 0xd83   :  { %v764_v45 = vadd.f32 %v762_v42, %v754_v2 }
 0xd85   :  { %1245 = vtanh.f32 %v764_v45  ;;  %v846_v21 = vrot.slane %v764_v45, 6 }
 0xd86   :  { %1247 = vpow2.f32 %v1112_v51 }
 0xd8f   :  { %v1246_v46 = vpop.eup %1245 }
 0xd90   :  { %767 = vrot.lane.b32.xlu1 %v1246_v46, %s1327_s2  ;;  %v1248_v53 = vpop.eup %1247 }
 0xd91   :  { %v745_v54 = vadd.f32 1.0, %v1248_v53 }
 0xd93   :  { %1249 = vrcp.f32 %v745_v54 }
 0xd9d   :  { %v1250_v56 = vpop.eup %1249 }
 0xe02   :  { %v768_v57 = vpop.permute.xlu1 %767 }
 0xe03   :  { %v1600_v50 = vmul.f32 %v1250_v56, %v768_v57  ;;  %v1175_v56 = vld [vmem:[%s1679_s4] sm:$0xff]  }
 0xe05   :  { %771 = vst.msk [vmem:[#allocation2 + $0x8] sm:$0xc] %vm400_vm5, %v1600_v50  ;;  %v777_v58 = vpack.c.bf16 %v1600_v50, %v1600_v50 }
 0xe07   :  { %v779_v59 = vrot.slane %v777_v58, 1  ;;  %v1329_v58 = vmov 0.0  }
 0xe08   :  { %1130 = vmatprep.subr.bf16.mxu1 %v1329_v58 }
 0xe09   :  { %1113 = vmatmul.mubr.msk.bf16.vlgmr.msra.gmra.mrb[12].mxu1 %vm230_vm4, %v779_v59 }
 0xe0a   :  { %1131 = vmatpush3.bf16.msra.mxu1 %v1175_v56  ;;  %1138 = vmatprep.mubr.msk.bf16.mxu1 %vm1330_vm8, %v1329_v58 }
 0xe0b   :  { %1132 = vmatprep.subr.bf16.mxu1 %v1329_v58 }
 0xedc   :  { %v817_v60 = vpop.f32.mrb[12].mxu1 }
 0xedd   :  { %v819_v62 = vpop.f32.mrb[13].mxu1  ;;  %v826_v9 = vrot.slane %v817_v60, 4 }
 0xede   :  { %v827_v63 = vrot.slane %v819_v62, 4  ;;  %v821_v1 = vpop.f32.mrb[14].mxu1  ;;  %v1178_v62 = vld [vmem:[%s1679_s4 + $0x18] sm:$0xff]  }
 0xedf   :  { %v822_v3 = vpop.f32.mrb[15].mxu1  ;;  %v830_v10 = vadd.f32 %v826_v9, %v1462_v43 }
 0xee0   :  { %v831_v5 = vadd.f32 %v827_v63, %v1470_v47 }
 0xee1   :  { %v1114_v12 = vmul.f32 -1.442695, %v830_v10 }
 0xee2   :  { %1251 = vtanh.f32 %v831_v5  ;;  %v1115_v24 = vmul.f32 -1.442695, %v831_v5 }
 0xee3   :  { %1253 = vpow2.f32 %v1114_v12  ;;  %v965_v12 = vld [vmem:[#allocation2] sm:$0xff] }
 0xeec   :  { %v1252_v7 = vpop.eup %1251 }
 0xeed   :  { %850 = vrot.lane.b32.xlu0 %v1252_v7, %s1327_s2  ;;  %v1254_v16 = vpop.eup %1253 }
 0xeee   :  { %v838_v17 = vadd.f32 1.0, %v1254_v16 }
 0xef0   :  { %1255 = vrcp.f32 %v838_v17 }
 0xefa   :  { %v1256_v18 = vpop.eup %1255 }
 0xefb   :  { %v848_v22 = vmul.f32 %v1256_v18, %v846_v21 }
 0xf5f   :  { %v851_v19 = vpop.permute.xlu0 %850 }
 0xf60   :  { %v853_v52 = vmul.f32 %v1256_v18, %v851_v19 }
 0xf62   :  { %855 = vrot.lane.b32.xlu1 %v853_v52, %s1327_s2  ;;  %v1119_v52 = vld [vmem:[%s1680_s5] ss:$0 sm:$0xff] }
 0xfd4   :  { %v856_v47 = vpop.permute.xlu1 %855 }
 0xfd5   :  { %v858_v23 = vadd.f32 %v856_v47, %v848_v22 }
 0xfd7   :  { %1257 = vtanh.f32 %v858_v23 }
 0xfd8   :  { %1259 = vpow2.f32 %v1115_v24 }
 0xfe1   :  { %v1258_v49 = vpop.eup %1257 }
 0xfe2   :  { %861 = vrot.lane.b32.xlu0 %v1258_v49, %s1327_s2  ;;  %v1260_v43 = vpop.eup %1259 }
 0xfe3   :  { %v839_v25 = vadd.f32 1.0, %v1260_v43 }
 0xfe5   :  { %1261 = vrcp.f32 %v839_v25 }
 0xfef   :  { %v1262_v26 = vpop.eup %1261 }
0x1054   :  { %v862_v28 = vpop.permute.xlu0 %861 }
0x1055   :  { %v864_v29 = vmul.f32 %v1262_v26, %v862_v28 }
0x1057   :  { %865 = vst.msk [vmem:[#allocation2 + $0x8] sm:$0x30] %vm495_vm6, %v864_v29  ;;  %v871_v30 = vpack.c.bf16 %v864_v29, %v864_v29 }
0x1059   :  { %v873_v31 = vrot.slane %v871_v30, 2 }
0x105b   :  { %1116 = vmatmul.mubr.msk.bf16.vlgmr.msra.gmra.mrb[16].mxu0 %vm230_vm4, %v873_v31 }
0x112e   :  { %v911_v33 = vpop.f32.mrb[16].mxu0 }
0x112f   :  { %v913_v34 = vpop.f32.mrb[17].mxu0  ;;  %v920_v0 = vrot.slane %v911_v33, 2 }
0x1130   :  { %v921_v35 = vrot.slane %v913_v34, 2  ;;  %v915_v36 = vpop.f32.mrb[18].mxu0 }
0x1131   :  { %v916_v37 = vpop.f32.mrb[19].mxu0  ;;  %v924_v6 = vadd.f32 %v920_v0, %v1466_v44  ;;  %v940_v44 = vrot.slane %v858_v23, 6 }
0x1132   :  { %v925_v38 = vadd.f32 %v921_v35, %v1474_v48 }
0x1133   :  { %v1117_v8 = vmul.f32 -1.442695, %v924_v6 }
0x1134   :  { %1263 = vtanh.f32 %v925_v38 }
0x1135   :  { %1265 = vpow2.f32 %v1117_v8 }
0x113e   :  { %v1264_v4 = vpop.eup %1263 }
0x113f   :  { %944 = vrot.lane.b32.xlu1 %v1264_v4, %s1327_s2  ;;  %v1266_v11 = vpop.eup %1265 }
0x1140   :  { %v932_v13 = vadd.f32 1.0, %v1266_v11 }
0x1142   :  { %1267 = vrcp.f32 %v932_v13 }
0x114c   :  { %v1268_v14 = vpop.eup %1267 }
0x114d   :  { %v942_v48 = vmul.f32 %v1268_v14, %v940_v44 }
0x11b1   :  { %v945_v15 = vpop.permute.xlu1 %944 }
0x11b2   :  { %v947_v39 = vmul.f32 %v1268_v14, %v945_v15 }
0x11b4   :  { %949 = vrot.lane.b32.xlu0 %v947_v39, %s1327_s2 }
0x11b8   :  { %310 = vrot.lane.b32.xlu0 %v1497_v20, %s1328_s22 }
0x11bc   :  { %498 = vrot.lane.b32.xlu0 %v1539_v27, %s1328_s22 }
0x11c0   :  { %681 = vrot.lane.b32.xlu0 %v1580_v32, %s1328_s22  ;;  %v1118_v32 = vmul.f32 -1.442695, %v925_v38 }
0x11c4   :  { %867 = vrot.lane.b32.xlu0 %v864_v29, %s1328_s22 }
0x1226   :  { %v950_v40 = vpop.permute.xlu0 %949 }
0x1227   :  { %v952_v41 = vadd.f32 %v950_v40, %v942_v48 }
0x1229   :  { %1269 = vtanh.f32 %v952_v41 }
0x122a   :  { %v311_v2 = vpop.permute.xlu0 %310  ;;  %1271 = vpow2.f32 %v1118_v32 }
0x122b   :  { %313 = vst.msk [vmem:[#allocation3 + $0xe] sm:$0x3] %vm307_vm3, %v311_v2 }
0x122e   :  { %v499_v42 = vpop.permute.xlu0 %498 }
0x122f   :  { %501 = vst.msk [vmem:[#allocation3 + $0x6] sm:$0x30] %vm495_vm6, %v499_v42 }
0x1232   :  { %v682_v20 = vpop.permute.xlu0 %681 }
0x1233   :  { %v1270_v45 = vpop.eup %1269  ;;  %684 = vst.msk [vmem:[#allocation3 + $0x6] sm:$0x3] %vm307_vm3, %v682_v20 }
0x1234   :  { %955 = vrot.lane.b32.xlu1 %v1270_v45, %s1327_s2  ;;  %v1272_v46 = vpop.eup %1271 }
0x1235   :  { %v933_v51 = vadd.f32 1.0, %v1272_v46 }
0x1236   :  { %v868_v27 = vpop.permute.xlu0 %867 }
0x1237   :  { %870 = vst.msk [vmem:[#allocation3 - $0x2] sm:$0x30] %vm495_vm6, %v868_v27  ;;  %1273 = vrcp.f32 %v933_v51 }
0x1238   :  { %403 = vrot.lane.b32.xlu1 %v1518_v55, %s1328_s22  ;;  %v1176_v55 = vld [vmem:[%s1679_s4 + $0x8] sm:$0xff]  }
0x1239   :  { %1133 = vmatpush3.bf16.msra.mxu1 %v1176_v55 }
0x123a   :  { %1134 = vmatprep.subr.bf16.mxu1 %v1329_v58 }
0x123c   :  { %593 = vrot.lane.b32.xlu1 %v1560_v61, %s1328_s22 }
0x1240   :  { %773 = vrot.lane.b32.xlu1 %v1600_v50, %s1328_s22  ;;  %v1177_v50 = vld [vmem:[%s1679_s4 + $0x10] sm:$0xff]  }
0x1241   :  { %v1274_v53 = vpop.eup %1273  ;;  %1135 = vmatpush3.bf16.msra.mxu1 %v1177_v50 }
0x1242   :  { %1136 = vmatprep.subr.bf16.mxu1 %v1329_v58 }
0x1245   :  { %1137 = vmatpush3.bf16.msra.mxu1 %v1178_v62 }
0x12a6   :  { %v956_v54 = vpop.permute.xlu1 %955 }
0x12a7   :  { %v958_v57 = vmul.f32 %v1274_v53, %v956_v54 }
0x12a9   :  { %959 = vst.msk [vmem:[#allocation2 + $0x8] sm:$0xc0] %vm590_vm7, %v958_v57  ;;  %961 = vrot.lane.b32.xlu1 %v958_v57, %s1328_s22 }
0x12aa   :  { %v404_v61 = vpop.permute.xlu1 %403 }
0x12ab   :  { %406 = vst.msk [vmem:[#allocation3 + $0xa] sm:$0xc] %vm400_vm5, %v404_v61 }
0x12ae   :  { %v594_v59 = vpop.permute.xlu1 %593 }
0x12af   :  { %596 = vst.msk [vmem:[#allocation3 + $0x2] sm:$0xc0] %vm590_vm7, %v594_v59 }
0x12b0   :  { %v966_v16 = vld [vmem:[#allocation2 + $0x8] sm:$0xff] }
0x12b2   :  { %v774_v60 = vpop.permute.xlu1 %773 }
0x12b3   :  { %776 = vst.msk [vmem:[#allocation3 + $0x2] sm:$0xc] %vm400_vm5, %v774_v60 }
0x12b6   :  { %v968_v3 = vld [vmem:[#allocation3 + $0x8] sm:$0xff] }
0x131b   :  { %v962_v63 = vpop.permute.xlu1 %961 }
0x131c   :  { %964 = vst.msk [vmem:[#allocation3 - $0x6] sm:$0xc0] %vm590_vm7, %v962_v63 }
0x1323   :  { %v967_v1 = vld [vmem:[#allocation3] sm:$0xff] }
0x1324   :  { %v1152_v5 = vpack.i.bf16 %v968_v3, %v967_v1 }
0x1326   :  { %1153 = vrot.lane.b32.xlu0 %v1152_v5, %s1331_s9 }
0x1398   :  { %v1154_v7 = vpop.permute.xlu0 %1153 }
0x1399   :  { %v1156_v9 = vunpack.i.h.bf16 %v1154_v7  ;;  %v1155_v10 = vunpack.i.l.bf16 %v1154_v7 }
0x139b   :  { %v977_v17 = vsel %vm78_vm0, %v965_v12, %v1155_v10  ;;  %v978_v18 = vsel %vm78_vm0, %v966_v16, %v1156_v9 }
0x139c   :  { %v979_v19 = vpack.c.bf16 %v978_v18, %v977_v17 }
0x139e   :  { %1139 = vmatmul.mubr.msk.bf16.vlgmr.msra.gmra.mrb[16].mxu1 %vm230_vm4, %v979_v19 }
0x1471   :  { %v1056_v21 = vpop.f32.mrb[16].mxu1 }
0x1472   :  { %v1057_v22 = vadd.f32 %v1119_v52, %v1056_v21  ;;  %v1140_v47 = vpop.f32.mrb[17].mxu1 }
0x1473   :  { %v1059_v23 = vpop.f32.mrb[18].mxu1 }
0x1474   :  { %v1060_v49 = vadd.f32 %v1119_v52, %v1059_v23  ;;  %v1141_v24 = vpop.f32.mrb[19].mxu1  ;;  %1064 = vst.msk [vmem:[#allocation7] sm:$0xff] %vm1063_vm9, %v1057_v22 }
0x1476   :  { %1065 = vst.msk [vmem:[#allocation7 + $0x8] sm:$0xff] %vm1063_vm9, %v1060_v49 }
0x1477   :  { %1308 = shalt.err (!%p1305_p12)
}
0x1478   :  { %s1309_s3 = scalar_lea.hbm %s1681_s6, 256 }
0x1479   :  { %p1310_p13 = scmp.ne.s32.totalorder %s1681_s6, %s1309_s3  ;;  %p1313_p0 = scmp.lt.u32.totalorder %s1309_s3, %s1681_s6 }
0x147b   :  { %p1315_p1 = pnand %p1313_p0, %p1310_p13 }
0x147d   :  { %1318 = shalt.err (!%p1315_p1)
}
0x147e   :  { %1077 = dma.vmem_to_hbm [thread:$0]  %s1072_s12, 256, %s1681_s6, [#allocation6], %s1324_s7, %s1324_s7, %s1325_s8  }
0x147f   :  { %1321 = dma.done.wait [#allocation6], 256  }
0x1480   :  { %1322 = vsyncadd [#allocation6], 4294967040 }
0x1481   :  { %1081 = vsyncpa [#allocation5], 1 }
0x1482   :  { %1082 = vsyncpa [#allocation6], 1 }

</bundles_post_ra>
